<compile_context>
chip_gen: v7x
topology: tpu7x:2x2x1
jax: 0.10.0
libtpu: 0.0.40
codegen_flags: <defaults>
</compile_context>

<pallas_src>
import functools

import numpy as np
import jax
import jax.numpy as jnp
from jax.experimental import pallas as pl
from jax.experimental.pallas import tpu as pltpu

LEVEL = 3


# ----------------------------------------------------------------------------
# Host-side glue: hardware probe, packing / tiling heuristics, weight matrices.
# ----------------------------------------------------------------------------
def _tpu_budget():
    """(per-core VMEM bytes, prefer splitting the grid across >=2 cores)."""
    vmem = 64 << 20          # conservative default (v7x-like)
    try:
        info = pltpu.get_tpu_info()
        for name in ("vmem_capacity_bytes", "vmem_bytes", "vmem_size_bytes"):
            v = getattr(info, name, None)
            if v:
                vmem = int(v)
                break
    except Exception:
        pass
    prefer_multicore = vmem <= (80 << 20)   # small-VMEM / multi-TC generation
    return vmem, prefer_multicore


def _pick_pack(B, W):
    """Largest power-of-two divisor G of B with packed width approaching 256
    lanes (so the pooled width wp = G*W/2 stays >= 128 where possible)."""
    g = 1
    while B % (2 * g) == 0 and g * W < 256:
        g *= 2
    return g


def _pick_tb(Bp, h, Wp, itemsize, vmem_bytes, prefer_multicore):
    """Images per grid step and a footprint-derived vmem_limit_bytes."""
    wp = Wp // 2
    budget = max(8 << 20, int(vmem_bytes) // 4)   # ~32 MiB v5e/v6e, ~16 MiB v7x
    # double-buffered x/lap/down blocks per image + ~6 live f32 (h, Wp) temps
    per_img = 2 * (2 * (2 * h * Wp) + h * wp) * itemsize + 6 * h * Wp * 4
    fixed = 2 * (2 * Wp * wp) * 4                 # resident weight operands
    cap = max(1, (budget - fixed) // per_img)
    cands = [tb for tb in range(1, Bp + 1)
             if Bp % tb == 0 and (tb == Bp or (tb * h) % 8 == 0)]
    fitting = [tb for tb in cands if tb <= cap]
    if fitting:
        multi = [tb for tb in fitting if Bp // tb >= 2]
        tb = max(multi) if (prefer_multicore and multi) else max(fitting)
    else:
        # TODO(synk): add a row-tiling grid axis for huge images instead.
        tb = min(cands)
    footprint = tb * per_img + fixed
    vmem_limit = int(max(16 << 20,
                         min(int(vmem_bytes) - (8 << 20),
                             max(32 << 20, 2 * footprint))))
    return tb, vmem_limit


def _w_matrices(Wp, W_img):
    """Separable W-axis pool / bilinear-upsample matrices for the lane-packed
    slab (block-diagonal over the packed images), built once on the host."""
    wp, w_img = Wp // 2, W_img // 2
    r = np.arange(Wp)[:, None]
    c = np.arange(wp)[None, :]
    pwt = np.where(c == r // 2, 0.5, 0.0).astype(np.float32)            # (Wp, wp)

    t = np.arange(Wp)
    main = t // 2
    side = np.where(t % 2 == 0, main - 1, main + 1)
    base = (t // W_img) * w_img
    side = np.clip(side, base, base + w_img - 1)                         # per-image clamp
    s = np.arange(wp)[:, None]
    uwt = (np.where(s == main[None, :], 0.75, 0.0)
           + np.where(s == side[None, :], 0.25, 0.0)).astype(np.float32)  # (wp, Wp)
    return pwt, uwt


# ----------------------------------------------------------------------------
# Pallas kernel: one pyramid level on a row-pair lane-packed (Mh, 2*Wp) slab.
# ----------------------------------------------------------------------------
def _lap_level_kernel(x_ref, pwt_ref, uwt_ref, down_ref, lap_ref, *, h_img):
    Mh, Wp2 = x_ref.shape          # Mh = TB * h
    Wp = Wp2 // 2
    f32 = jnp.float32

    # even / odd image rows as static lane slices (no stride-2 sublane loads)
    x_even = x_ref[:, :Wp].astype(f32)
    x_odd = x_ref[:, Wp:].astype(f32)

    # H-axis average pool (VPU), then W-axis pool: one flattened MXU GEMM
    xh = 0.5 * (x_even + x_odd)                                   # (Mh, Wp)
    d = jnp.dot(xh, pwt_ref[...], preferred_element_type=f32)     # (Mh, wp)
    down_ref[...] = d.astype(down_ref.dtype)

    # W-axis bilinear 2x upsample (from the stored-precision down)
    uw = jnp.dot(d.astype(down_ref.dtype).astype(f32), uwt_ref[...],
                 preferred_element_type=f32)                      # (Mh, Wp)

    # H-axis bilinear 2x upsample:
    #   out_row(2i)   = 0.75*uw[i] + 0.25*uw[i-1]   (clamped at image top)
    #   out_row(2i+1) = 0.75*uw[i] + 0.25*uw[i+1]   (clamped at image bottom)
    if Mh > 1:
        row = jax.lax.broadcasted_iota(jnp.int32, (Mh, 1), 0) % h_img
        use_roll = (Mh % 8) == 0        # sublane-aligned: use the XLU roll path
        if use_roll:
            up_prev = pltpu.roll(uw, shift=1, axis=0)
        else:
            up_prev = jnp.concatenate([uw[:1, :], uw[:-1, :]], axis=0)
        up_prev = jnp.where(row == 0, uw, up_prev)
    else:
        up_prev = uw
    # store the even residual plane first (fewer (Mh, Wp) temps live at once)
    lap_ref[:, :Wp] = (x_even - (0.75 * uw + 0.25 * up_prev)).astype(lap_ref.dtype)

    if Mh > 1:
        if use_roll:
            up_next = pltpu.roll(uw, shift=Mh - 1, axis=0)
        else:
            up_next = jnp.concatenate([uw[1:, :], uw[-1:, :]], axis=0)
        up_next = jnp.where(row == h_img - 1, uw, up_next)
    else:
        up_next = uw
    lap_ref[:, Wp:] = (x_odd - (0.75 * uw + 0.25 * up_next)).astype(lap_ref.dtype)


def _lap_level(cur_p, W_img, vmem_bytes, prefer_multicore):
    """cur_p: (Bp, H, Wp) lane-packed -> (down (Bp, H/2, Wp/2), lap (Bp, H, Wp))."""
    Bp, H, Wp = cur_p.shape
    h, wp = H // 2, Wp // 2
    itemsize = np.dtype(cur_p.dtype).itemsize
    TB, vmem_limit = _pick_tb(Bp, h, Wp, itemsize, vmem_bytes, prefer_multicore)
    Mh = TB * h

    pwt, uwt = _w_matrices(Wp, W_img)
    # row-pair lane layout: (Bp, h, 2, Wp) -> (Bp*h, 2*Wp); free contiguous reshape
    x2 = cur_p.reshape(Bp * h, 2 * Wp)

    kernel = functools.partial(_lap_level_kernel, h_img=h)
    down2, lap2 = pl.pallas_call(
        kernel,
        out_shape=(
            jax.ShapeDtypeStruct((Bp * h, wp), cur_p.dtype),
            jax.ShapeDtypeStruct((Bp * h, 2 * Wp), cur_p.dtype),
        ),
        grid=(Bp // TB,),
        in_specs=[
            pl.BlockSpec((Mh, 2 * Wp), lambda b: (b, 0)),
            pl.BlockSpec((Wp, wp), lambda b: (0, 0)),   # VMEM-resident weights
            pl.BlockSpec((wp, Wp), lambda b: (0, 0)),
        ],
        out_specs=(
            pl.BlockSpec((Mh, wp), lambda b: (b, 0)),
            pl.BlockSpec((Mh, 2 * Wp), lambda b: (b, 0)),
        ),
        compiler_params=pltpu.CompilerParams(
            dimension_semantics=("parallel",),
            vmem_limit_bytes=vmem_limit,
        ),
    )(x2, jnp.asarray(pwt), jnp.asarray(uwt))

    down_p = down2.reshape(Bp, h, wp)
    # (Bp*h, 2*Wp) -> (Bp, h, 2, Wp) -> (Bp, H, Wp): free contiguous reshape,
    # this IS the even/odd row interleave (no extra HBM pass).
    lap_p = lap2.reshape(Bp, H, Wp)
    return down_p, lap_p


def _unpack(xp, N, C, G, H_img, W_img):
    """(Bp, H_img, G*W_img) lane-packed -> (N, C, H_img, W_img)."""
    Bp = xp.shape[0]
    return (xp.reshape(Bp, H_img, G, W_img)
              .transpose(0, 2, 1, 3)
              .reshape(N, C, H_img, W_img))


@functools.partial(jax.jit, static_argnames=("level",))
def laplacian_pyramid(x, level=LEVEL):
    """x: (N, C, H, W), NCHW like the PyTorch module."""
    N, C, H, W = x.shape
    B = N * C
    vmem_bytes, prefer_multi = _tpu_budget()

    G = _pick_pack(B, W)
    Bp = B // G
    # lane packing: G images side-by-side along the lane axis
    cur = x.reshape(Bp, G, H, W).transpose(0, 2, 1, 3).reshape(Bp, H, G * W)
    W_img = W
    pyr = []
    for _ in range(level):
        H_img = cur.shape[1]
        if H_img % 2 or W_img % 2:
            raise ValueError("spatial dims must stay even at every pyramid level")
        down_p, lap_p = _lap_level(cur, W_img, vmem_bytes, prefer_multi)
        pyr.append(_unpack(lap_p, N, C, G, H_img, W_img))
        cur = down_p
        W_img //= 2
        # re-pack lanes so the next level's stores stay >=128 (target 256) lanes
        while Bp % 2 == 0 and G * W_img < 256:
            h_c, wp_c = cur.shape[1], cur.shape[2]
            Bp //= 2
            G *= 2
            cur = (cur.reshape(Bp, 2, h_c, wp_c)
                      .transpose(0, 2, 1, 3)
                      .reshape(Bp, h_c, 2 * wp_c))
    pyr.append(_unpack(cur, N, C, G, cur.shape[1], W_img))
    # TODO(synk): the reference ends with torch.cat(pyr, 1), which raises for
    # level >= 1 because pyramid levels have different spatial sizes; we return
    # the per-level tensors as a tuple instead of faking a concat.
    return tuple(pyr)


# ----------------------------------------------------------------------------
# Independent numpy reference (direct avg-pool + direct bilinear interpolation).
# ----------------------------------------------------------------------------
def _bilinear_up2_np(d, H, W):
    h, w = d.shape[-2:]

    def coords(n_out, n_in):
        s = (np.arange(n_out) + 0.5) / 2.0 - 0.5
        s = np.maximum(s, 0.0)
        i0 = np.minimum(np.floor(s).astype(np.int64), n_in - 1)
        i1 = np.minimum(i0 + 1, n_in - 1)
        f = (s - i0).astype(np.float32)
        return i0, i1, f

    r0, r1, fr = coords(H, h)
    c0, c1, fc = coords(W, w)
    a = d[:, :, r0, :]
    b = d[:, :, r1, :]
    a0, a1 = a[:, :, :, c0], a[:, :, :, c1]
    b0, b1 = b[:, :, :, c0], b[:, :, :, c1]
    fr_ = fr[None, None, :, None]
    fc_ = fc[None, None, None, :]
    top = (1.0 - fc_) * a0 + fc_ * a1
    bot = (1.0 - fc_) * b0 + fc_ * b1
    return (1.0 - fr_) * top + fr_ * bot


def _ref_pyramid(x, level):
    cur = x.astype(np.float32)
    pyr = []
    for _ in range(level):
        Hc, Wc = cur.shape[-2:]
        down = 0.25 * (cur[:, :, 0::2, 0::2] + cur[:, :, 0::2, 1::2]
                       + cur[:, :, 1::2, 0::2] + cur[:, :, 1::2, 1::2])
        up = _bilinear_up2_np(down, Hc, Wc)
        pyr.append(cur - up)
        cur = down
    pyr.append(cur)
    return pyr


if __name__ == "__main__":
    key = jax.random.PRNGKey(0)
    x = jax.random.normal(key, (2, 4, 16, 16), dtype=jnp.float32)

    out = laplacian_pyramid(x, level=LEVEL)
    out = jax.block_until_ready(out)

    ref = _ref_pyramid(np.asarray(x), LEVEL)
    assert len(out) == len(ref)
    for o, r in zip(out, ref):
        assert o.shape == r.shape, (o.shape, r.shape)
        np.testing.assert_allclose(np.asarray(o), r, rtol=1e-5, atol=1e-5)

    print("KERNEL_OK")
</pallas_src>

<mosaic_0001>
module attributes {stable_mosaic.version = 11 : i64} {
  func.func @_lap_level_kernel(%arg0: i32, %arg1: memref<8x256xf32, #tpu.memory_space<vmem>>, %arg2: memref<128x64xf32, #tpu.memory_space<vmem>>, %arg3: memref<64x128xf32, #tpu.memory_space<vmem>>, %arg4: memref<8x64xf32, #tpu.memory_space<vmem>>, %arg5: memref<8x256xf32, #tpu.memory_space<vmem>>) attributes {dimension_semantics = [#tpu.dimension_semantics<parallel>], iteration_bounds = array<i64: 1>, scalar_prefetch = 0 : i64, scratch_operands = 0 : i64, tpu.core_type = #tpu.core_type<tc>, window_params = [{transform_indices = @transform_0, window_bounds = array<i64: 8, 256>}, {pipeline_mode = #tpu.pipeline_mode<synchronous>, transform_indices = @transform_1, window_bounds = array<i64: 128, 64>}, {pipeline_mode = #tpu.pipeline_mode<synchronous>, transform_indices = @transform_2, window_bounds = array<i64: 64, 128>}, {transform_indices = @transform_3, window_bounds = array<i64: 8, 64>}, {transform_indices = @transform_4, window_bounds = array<i64: 8, 256>}]} {
    %c0 = arith.constant 0 : index
    %c0_0 = arith.constant 0 : index
    %0 = vector.load %arg1[%c0, %c0_0] : memref<8x256xf32, #tpu.memory_space<vmem>>, vector<8x128xf32>
    %c0_1 = arith.constant 0 : index
    %c128 = arith.constant 128 : index
    %1 = vector.load %arg1[%c0_1, %c128] : memref<8x256xf32, #tpu.memory_space<vmem>>, vector<8x128xf32>
    %2 = arith.addf %0, %1 : vector<8x128xf32>
    %cst = arith.constant 5.000000e-01 : f32
    %3 = vector.broadcast %cst : f32 to vector<8x128xf32>
    %4 = arith.mulf %3, %2 : vector<8x128xf32>
    %c0_2 = arith.constant 0 : index
    %c0_3 = arith.constant 0 : index
    %5 = vector.load %arg2[%c0_2, %c0_3] : memref<128x64xf32, #tpu.memory_space<vmem>>, vector<128x64xf32>
    %cst_4 = arith.constant dense<0.000000e+00> : vector<8x64xf32>
    %6 = tpu.matmul %4, %5, %cst_4 {dimension_numbers = #tpu.dot_dimension_numbers<[1], [0], [0], [1], [0, 0, 1, 1], [], []>} : vector<8x128xf32>, vector<128x64xf32>, vector<8x64xf32> -> vector<8x64xf32>
    %c0_5 = arith.constant 0 : index
    %c0_6 = arith.constant 0 : index
    %7 = vector.load %arg4[%c0_5, %c0_6] : memref<8x64xf32, #tpu.memory_space<vmem>>, vector<8x64xf32>
    tpu.vector_store %arg4[%c0_5, %c0_6], %6 {strides = array<i32>} : memref<8x64xf32, #tpu.memory_space<vmem>>, vector<8x64xf32>,
    %c0_7 = arith.constant 0 : index
    %c0_8 = arith.constant 0 : index
    %8 = vector.load %arg3[%c0_7, %c0_8] : memref<64x128xf32, #tpu.memory_space<vmem>>, vector<64x128xf32>
    %cst_9 = arith.constant dense<0.000000e+00> : vector<8x128xf32>
    %9 = tpu.matmul %6, %8, %cst_9 {dimension_numbers = #tpu.dot_dimension_numbers<[1], [0], [0], [1], [0, 0, 1, 1], [], []>} : vector<8x64xf32>, vector<64x128xf32>, vector<8x128xf32> -> vector<8x128xf32>
    %10 = tpu.iota {dimensions = array<i32: 0>} : vector<8x1xi32>
    %c8_i32 = arith.constant 8 : i32
    %c0_i32 = arith.constant 0 : i32
    %11 = arith.cmpi eq, %c8_i32, %c0_i32 : i32
    %c1_i32 = arith.constant 1 : i32
    %12 = arith.select %11, %c1_i32, %c8_i32 : i32
    %13 = vector.broadcast %12 : i32 to vector<8x1xi32>
    %14 = arith.remsi %10, %13 : vector<8x1xi32>
    %c0_i32_10 = arith.constant 0 : i32
    %15 = vector.broadcast %c0_i32_10 : i32 to vector<8x1xi32>
    %16 = arith.cmpi ne, %14, %15 : vector<8x1xi32>
    %c0_i32_11 = arith.constant 0 : i32
    %17 = vector.broadcast %c0_i32_11 : i32 to vector<8x1xi32>
    %18 = arith.cmpi slt, %14, %17 : vector<8x1xi32>
    %c0_i32_12 = arith.constant 0 : i32
    %19 = arith.cmpi slt, %12, %c0_i32_12 : i32
    %20 = vector.broadcast %19 : i1 to vector<8x1xi1>
    %21 = vector.broadcast %20 : vector<8x1xi1> to vector<8x1xi1>
    %22 = arith.xori %18, %21 : vector<8x1xi1>
    %23 = arith.andi %22, %16 : vector<8x1xi1>
    %24 = vector.broadcast %12 : i32 to vector<8x1xi32>
    %25 = arith.addi %14, %24 : vector<8x1xi32>
    %26 = arith.select %23, %25, %14 : vector<8x1xi1>, vector<8x1xi32>
    %c1_i32_13 = arith.constant 1 : i32
    %27 = tpu.dynamic_rotate %9 by %c1_i32_13 dim 0 : vector<8x128xf32>, i32 -> vector<8x128xf32>
    %c0_i32_14 = arith.constant 0 : i32
    %28 = vector.broadcast %c0_i32_14 : i32 to vector<8x1xi32>
    %29 = arith.cmpi eq, %26, %28 : vector<8x1xi32>
    %30 = vector.shape_cast %29 : vector<8x1xi1> to vector<8x1xi1>
    %31 = vector.broadcast %30 : vector<8x1xi1> to vector<8x128xi1>
    %32 = arith.select %31, %9, %27 : vector<8x128xi1>, vector<8x128xf32>
    %cst_15 = arith.constant 7.500000e-01 : f32
    %33 = vector.broadcast %cst_15 : f32 to vector<8x128xf32>
    %34 = arith.mulf %33, %9 : vector<8x128xf32>
    %cst_16 = arith.constant 2.500000e-01 : f32
    %35 = vector.broadcast %cst_16 : f32 to vector<8x128xf32>
    %36 = arith.mulf %35, %32 : vector<8x128xf32>
    %37 = arith.addf %34, %36 : vector<8x128xf32>
    %38 = arith.subf %0, %37 : vector<8x128xf32>
    %c0_17 = arith.constant 0 : index
    %c0_18 = arith.constant 0 : index
    %39 = vector.load %arg5[%c0_17, %c0_18] : memref<8x256xf32, #tpu.memory_space<vmem>>, vector<8x128xf32>
    tpu.vector_store %arg5[%c0_17, %c0_18], %38 {strides = array<i32>} : memref<8x256xf32, #tpu.memory_space<vmem>>, vector<8x128xf32>,
    %c7_i32 = arith.constant 7 : i32
    %40 = tpu.dynamic_rotate %9 by %c7_i32 dim 0 : vector<8x128xf32>, i32 -> vector<8x128xf32>
    %c7_i32_19 = arith.constant 7 : i32
    %41 = vector.broadcast %c7_i32_19 : i32 to vector<8x1xi32>
    %42 = arith.cmpi eq, %26, %41 : vector<8x1xi32>
    %43 = vector.shape_cast %42 : vector<8x1xi1> to vector<8x1xi1>
    %44 = vector.broadcast %43 : vector<8x1xi1> to vector<8x128xi1>
    %45 = arith.select %44, %9, %40 : vector<8x128xi1>, vector<8x128xf32>
    %cst_20 = arith.constant 7.500000e-01 : f32
    %46 = vector.broadcast %cst_20 : f32 to vector<8x128xf32>
    %47 = arith.mulf %46, %9 : vector<8x128xf32>
    %cst_21 = arith.constant 2.500000e-01 : f32
    %48 = vector.broadcast %cst_21 : f32 to vector<8x128xf32>
    %49 = arith.mulf %48, %45 : vector<8x128xf32>
    %50 = arith.addf %47, %49 : vector<8x128xf32>
    %51 = arith.subf %1, %50 : vector<8x128xf32>
    %c0_22 = arith.constant 0 : index
    %c128_23 = arith.constant 128 : index
    %52 = vector.load %arg5[%c0_22, %c128_23] : memref<8x256xf32, #tpu.memory_space<vmem>>, vector<8x128xf32>
    tpu.vector_store %arg5[%c0_22, %c128_23], %51 {strides = array<i32>} : memref<8x256xf32, #tpu.memory_space<vmem>>, vector<8x128xf32>,
    return
  }
  func.func @transform_0(%arg0: i32) -> (i32, i32) {
    %c0_i32 = arith.constant 0 : i32
    %c0_i32_0 = arith.constant 0 : i32
    return %arg0, %c0_i32 : i32, i32
  }
  func.func @transform_1(%arg0: i32) -> (i32, i32) {
    %c0_i32 = arith.constant 0 : i32
    %c0_i32_0 = arith.constant 0 : i32
    %c0_i32_1 = arith.constant 0 : i32
    return %c0_i32, %c0_i32_0 : i32, i32
  }
  func.func @transform_2(%arg0: i32) -> (i32, i32) {
    %c0_i32 = arith.constant 0 : i32
    %c0_i32_0 = arith.constant 0 : i32
    %c0_i32_1 = arith.constant 0 : i32
    return %c0_i32, %c0_i32_0 : i32, i32
  }
  func.func @transform_3(%arg0: i32) -> (i32, i32) {
    %c0_i32 = arith.constant 0 : i32
    %c0_i32_0 = arith.constant 0 : i32
    return %arg0, %c0_i32 : i32, i32
  }
  func.func @transform_4(%arg0: i32) -> (i32, i32) {
    %c0_i32 = arith.constant 0 : i32
    %c0_i32_0 = arith.constant 0 : i32
    return %arg0, %c0_i32 : i32, i32
  }
}

module attributes {stable_mosaic.version = 11 : i64} {
  func.func @_lap_level_kernel(%arg0: i32, %arg1: memref<4x128xf32, #tpu.memory_space<vmem>>, %arg2: memref<64x32xf32, #tpu.memory_space<vmem>>, %arg3: memref<32x64xf32, #tpu.memory_space<vmem>>, %arg4: memref<4x32xf32, #tpu.memory_space<vmem>>, %arg5: memref<4x128xf32, #tpu.memory_space<vmem>>) attributes {dimension_semantics = [#tpu.dimension_semantics<parallel>], iteration_bounds = array<i64: 1>, scalar_prefetch = 0 : i64, scratch_operands = 0 : i64, tpu.core_type = #tpu.core_type<tc>, window_params = [{transform_indices = @transform_0, window_bounds = array<i64: 4, 128>}, {pipeline_mode = #tpu.pipeline_mode<synchronous>, transform_indices = @transform_1, window_bounds = array<i64: 64, 32>}, {pipeline_mode = #tpu.pipeline_mode<synchronous>, transform_indices = @transform_2, window_bounds = array<i64: 32, 64>}, {transform_indices = @transform_3, window_bounds = array<i64: 4, 32>}, {transform_indices = @transform_4, window_bounds = array<i64: 4, 128>}]} {
    %c0 = arith.constant 0 : index
    %c0_0 = arith.constant 0 : index
    %0 = vector.load %arg1[%c0, %c0_0] : memref<4x128xf32, #tpu.memory_space<vmem>>, vector<4x64xf32>
    %c0_1 = arith.constant 0 : index
    %c64 = arith.constant 64 : index
    %1 = vector.load %arg1[%c0_1, %c64] : memref<4x128xf32, #tpu.memory_space<vmem>>, vector<4x64xf32>
    %2 = arith.addf %0, %1 : vector<4x64xf32>
    %cst = arith.constant 5.000000e-01 : f32
    %3 = vector.broadcast %cst : f32 to vector<4x64xf32>
    %4 = arith.mulf %3, %2 : vector<4x64xf32>
    %c0_2 = arith.constant 0 : index
    %c0_3 = arith.constant 0 : index
    %5 = vector.load %arg2[%c0_2, %c0_3] : memref<64x32xf32, #tpu.memory_space<vmem>>, vector<64x32xf32>
    %cst_4 = arith.constant dense<0.000000e+00> : vector<4x32xf32>
    %6 = tpu.matmul %4, %5, %cst_4 {dimension_numbers = #tpu.dot_dimension_numbers<[1], [0], [0], [1], [0, 0, 1, 1], [], []>} : vector<4x64xf32>, vector<64x32xf32>, vector<4x32xf32> -> vector<4x32xf32>
    %c0_5 = arith.constant 0 : index
    %c0_6 = arith.constant 0 : index
    %7 = vector.load %arg4[%c0_5, %c0_6] : memref<4x32xf32, #tpu.memory_space<vmem>>, vector<4x32xf32>
    tpu.vector_store %arg4[%c0_5, %c0_6], %6 {strides = array<i32>} : memref<4x32xf32, #tpu.memory_space<vmem>>, vector<4x32xf32>,
    %c0_7 = arith.constant 0 : index
    %c0_8 = arith.constant 0 : index
    %8 = vector.load %arg3[%c0_7, %c0_8] : memref<32x64xf32, #tpu.memory_space<vmem>>, vector<32x64xf32>
    %cst_9 = arith.constant dense<0.000000e+00> : vector<4x64xf32>
    %9 = tpu.matmul %6, %8, %cst_9 {dimension_numbers = #tpu.dot_dimension_numbers<[1], [0], [0], [1], [0, 0, 1, 1], [], []>} : vector<4x32xf32>, vector<32x64xf32>, vector<4x64xf32> -> vector<4x64xf32>
    %10 = tpu.iota {dimensions = array<i32: 0>} : vector<4x1xi32>
    %c4_i32 = arith.constant 4 : i32
    %c0_i32 = arith.constant 0 : i32
    %11 = arith.cmpi eq, %c4_i32, %c0_i32 : i32
    %c1_i32 = arith.constant 1 : i32
    %12 = arith.select %11, %c1_i32, %c4_i32 : i32
    %13 = vector.broadcast %12 : i32 to vector<4x1xi32>
    %14 = arith.remsi %10, %13 : vector<4x1xi32>
    %c0_i32_10 = arith.constant 0 : i32
    %15 = vector.broadcast %c0_i32_10 : i32 to vector<4x1xi32>
    %16 = arith.cmpi ne, %14, %15 : vector<4x1xi32>
    %c0_i32_11 = arith.constant 0 : i32
    %17 = vector.broadcast %c0_i32_11 : i32 to vector<4x1xi32>
    %18 = arith.cmpi slt, %14, %17 : vector<4x1xi32>
    %c0_i32_12 = arith.constant 0 : i32
    %19 = arith.cmpi slt, %12, %c0_i32_12 : i32
    %20 = vector.broadcast %19 : i1 to vector<4x1xi1>
    %21 = vector.broadcast %20 : vector<4x1xi1> to vector<4x1xi1>
    %22 = arith.xori %18, %21 : vector<4x1xi1>
    %23 = arith.andi %22, %16 : vector<4x1xi1>
    %24 = vector.broadcast %12 : i32 to vector<4x1xi32>
    %25 = arith.addi %14, %24 : vector<4x1xi32>
    %26 = arith.select %23, %25, %14 : vector<4x1xi1>, vector<4x1xi32>
    %27 = vector.extract_strided_slice %9 {offsets = [0, 0], sizes = [1, 64], strides = [1, 1]} : vector<4x64xf32> to vector<1x64xf32>
    %28 = vector.extract_strided_slice %9 {offsets = [0, 0], sizes = [3, 64], strides = [1, 1]} : vector<4x64xf32> to vector<3x64xf32>
    %29 = tpu.concatenate %27, %28 in 0 : vector<1x64xf32>, vector<3x64xf32> -> vector<4x64xf32>
    %c0_i32_13 = arith.constant 0 : i32
    %30 = vector.broadcast %c0_i32_13 : i32 to vector<4x1xi32>
    %31 = arith.cmpi eq, %26, %30 : vector<4x1xi32>
    %32 = vector.shape_cast %31 : vector<4x1xi1> to vector<4x1xi1>
    %33 = vector.broadcast %32 : vector<4x1xi1> to vector<4x64xi1>
    %34 = arith.select %33, %9, %29 : vector<4x64xi1>, vector<4x64xf32>
    %cst_14 = arith.constant 7.500000e-01 : f32
    %35 = vector.broadcast %cst_14 : f32 to vector<4x64xf32>
    %36 = arith.mulf %35, %9 : vector<4x64xf32>
    %cst_15 = arith.constant 2.500000e-01 : f32
    %37 = vector.broadcast %cst_15 : f32 to vector<4x64xf32>
    %38 = arith.mulf %37, %34 : vector<4x64xf32>
    %39 = arith.addf %36, %38 : vector<4x64xf32>
    %40 = arith.subf %0, %39 : vector<4x64xf32>
    %c0_16 = arith.constant 0 : index
    %c0_17 = arith.constant 0 : index
    %41 = vector.load %arg5[%c0_16, %c0_17] : memref<4x128xf32, #tpu.memory_space<vmem>>, vector<4x64xf32>
    tpu.vector_store %arg5[%c0_16, %c0_17], %40 {strides = array<i32>} : memref<4x128xf32, #tpu.memory_space<vmem>>, vector<4x64xf32>,
    %42 = vector.extract_strided_slice %9 {offsets = [1, 0], sizes = [3, 64], strides = [1, 1]} : vector<4x64xf32> to vector<3x64xf32>
    %43 = vector.extract_strided_slice %9 {offsets = [3, 0], sizes = [1, 64], strides = [1, 1]} : vector<4x64xf32> to vector<1x64xf32>
    %44 = tpu.concatenate %42, %43 in 0 : vector<3x64xf32>, vector<1x64xf32> -> vector<4x64xf32>
    %c3_i32 = arith.constant 3 : i32
    %45 = vector.broadcast %c3_i32 : i32 to vector<4x1xi32>
    %46 = arith.cmpi eq, %26, %45 : vector<4x1xi32>
    %47 = vector.shape_cast %46 : vector<4x1xi1> to vector<4x1xi1>
    %48 = vector.broadcast %47 : vector<4x1xi1> to vector<4x64xi1>
    %49 = arith.select %48, %9, %44 : vector<4x64xi1>, vector<4x64xf32>
    %cst_18 = arith.constant 7.500000e-01 : f32
    %50 = vector.broadcast %cst_18 : f32 to vector<4x64xf32>
    %51 = arith.mulf %50, %9 : vector<4x64xf32>
    %cst_19 = arith.constant 2.500000e-01 : f32
    %52 = vector.broadcast %cst_19 : f32 to vector<4x64xf32>
    %53 = arith.mulf %52, %49 : vector<4x64xf32>
    %54 = arith.addf %51, %53 : vector<4x64xf32>
    %55 = arith.subf %1, %54 : vector<4x64xf32>
    %c0_20 = arith.constant 0 : index
    %c64_21 = arith.constant 64 : index
    %56 = vector.load %arg5[%c0_20, %c64_21] : memref<4x128xf32, #tpu.memory_space<vmem>>, vector<4x64xf32>
    tpu.vector_store %arg5[%c0_20, %c64_21], %55 {strides = array<i32>} : memref<4x128xf32, #tpu.memory_space<vmem>>, vector<4x64xf32>,
    return
  }
  func.func @transform_0(%arg0: i32) -> (i32, i32) {
    %c0_i32 = arith.constant 0 : i32
    %c0_i32_0 = arith.constant 0 : i32
    return %arg0, %c0_i32 : i32, i32
  }
  func.func @transform_1(%arg0: i32) -> (i32, i32) {
    %c0_i32 = arith.constant 0 : i32
    %c0_i32_0 = arith.constant 0 : i32
    %c0_i32_1 = arith.constant 0 : i32
    return %c0_i32, %c0_i32_0 : i32, i32
  }
  func.func @transform_2(%arg0: i32) -> (i32, i32) {
    %c0_i32 = arith.constant 0 : i32
    %c0_i32_0 = arith.constant 0 : i32
    %c0_i32_1 = arith.constant 0 : i32
    return %c0_i32, %c0_i32_0 : i32, i32
  }
  func.func @transform_3(%arg0: i32) -> (i32, i32) {
    %c0_i32 = arith.constant 0 : i32
    %c0_i32_0 = arith.constant 0 : i32
    return %arg0, %c0_i32 : i32, i32
  }
  func.func @transform_4(%arg0: i32) -> (i32, i32) {
    %c0_i32 = arith.constant 0 : i32
    %c0_i32_0 = arith.constant 0 : i32
    return %arg0, %c0_i32 : i32, i32
  }
}

module attributes {stable_mosaic.version = 11 : i64} {
  func.func @_lap_level_kernel(%arg0: i32, %arg1: memref<2x64xf32, #tpu.memory_space<vmem>>, %arg2: memref<32x16xf32, #tpu.memory_space<vmem>>, %arg3: memref<16x32xf32, #tpu.memory_space<vmem>>, %arg4: memref<2x16xf32, #tpu.memory_space<vmem>>, %arg5: memref<2x64xf32, #tpu.memory_space<vmem>>) attributes {dimension_semantics = [#tpu.dimension_semantics<parallel>], iteration_bounds = array<i64: 1>, scalar_prefetch = 0 : i64, scratch_operands = 0 : i64, tpu.core_type = #tpu.core_type<tc>, window_params = [{transform_indices = @transform_0, window_bounds = array<i64: 2, 64>}, {pipeline_mode = #tpu.pipeline_mode<synchronous>, transform_indices = @transform_1, window_bounds = array<i64: 32, 16>}, {pipeline_mode = #tpu.pipeline_mode<synchronous>, transform_indices = @transform_2, window_bounds = array<i64: 16, 32>}, {transform_indices = @transform_3, window_bounds = array<i64: 2, 16>}, {transform_indices = @transform_4, window_bounds = array<i64: 2, 64>}]} {
    %c0 = arith.constant 0 : index
    %c0_0 = arith.constant 0 : index
    %0 = vector.load %arg1[%c0, %c0_0] : memref<2x64xf32, #tpu.memory_space<vmem>>, vector<2x32xf32>
    %c0_1 = arith.constant 0 : index
    %c32 = arith.constant 32 : index
    %1 = vector.load %arg1[%c0_1, %c32] : memref<2x64xf32, #tpu.memory_space<vmem>>, vector<2x32xf32>
    %2 = arith.addf %0, %1 : vector<2x32xf32>
    %cst = arith.constant 5.000000e-01 : f32
    %3 = vector.broadcast %cst : f32 to vector<2x32xf32>
    %4 = arith.mulf %3, %2 : vector<2x32xf32>
    %c0_2 = arith.constant 0 : index
    %c0_3 = arith.constant 0 : index
    %5 = vector.load %arg2[%c0_2, %c0_3] : memref<32x16xf32, #tpu.memory_space<vmem>>, vector<32x16xf32>
    %cst_4 = arith.constant dense<0.000000e+00> : vector<2x16xf32>
    %6 = tpu.matmul %4, %5, %cst_4 {dimension_numbers = #tpu.dot_dimension_numbers<[1], [0], [0], [1], [0, 0, 1, 1], [], []>} : vector<2x32xf32>, vector<32x16xf32>, vector<2x16xf32> -> vector<2x16xf32>
    %c0_5 = arith.constant 0 : index
    %c0_6 = arith.constant 0 : index
    %7 = vector.load %arg4[%c0_5, %c0_6] : memref<2x16xf32, #tpu.memory_space<vmem>>, vector<2x16xf32>
    tpu.vector_store %arg4[%c0_5, %c0_6], %6 {strides = array<i32>} : memref<2x16xf32, #tpu.memory_space<vmem>>, vector<2x16xf32>,
    %c0_7 = arith.constant 0 : index
    %c0_8 = arith.constant 0 : index
    %8 = vector.load %arg3[%c0_7, %c0_8] : memref<16x32xf32, #tpu.memory_space<vmem>>, vector<16x32xf32>
    %cst_9 = arith.constant dense<0.000000e+00> : vector<2x32xf32>
    %9 = tpu.matmul %6, %8, %cst_9 {dimension_numbers = #tpu.dot_dimension_numbers<[1], [0], [0], [1], [0, 0, 1, 1], [], []>} : vector<2x16xf32>, vector<16x32xf32>, vector<2x32xf32> -> vector<2x32xf32>
    %10 = tpu.iota {dimensions = array<i32: 0>} : vector<2x1xi32>
    %c2_i32 = arith.constant 2 : i32
    %c0_i32 = arith.constant 0 : i32
    %11 = arith.cmpi eq, %c2_i32, %c0_i32 : i32
    %c1_i32 = arith.constant 1 : i32
    %12 = arith.select %11, %c1_i32, %c2_i32 : i32
    %13 = vector.broadcast %12 : i32 to vector<2x1xi32>
    %14 = arith.remsi %10, %13 : vector<2x1xi32>
    %c0_i32_10 = arith.constant 0 : i32
    %15 = vector.broadcast %c0_i32_10 : i32 to vector<2x1xi32>
    %16 = arith.cmpi ne, %14, %15 : vector<2x1xi32>
    %c0_i32_11 = arith.constant 0 : i32
    %17 = vector.broadcast %c0_i32_11 : i32 to vector<2x1xi32>
    %18 = arith.cmpi slt, %14, %17 : vector<2x1xi32>
    %c0_i32_12 = arith.constant 0 : i32
    %19 = arith.cmpi slt, %12, %c0_i32_12 : i32
    %20 = vector.broadcast %19 : i1 to vector<2x1xi1>
    %21 = vector.broadcast %20 : vector<2x1xi1> to vector<2x1xi1>
    %22 = arith.xori %18, %21 : vector<2x1xi1>
    %23 = arith.andi %22, %16 : vector<2x1xi1>
    %24 = vector.broadcast %12 : i32 to vector<2x1xi32>
    %25 = arith.addi %14, %24 : vector<2x1xi32>
    %26 = arith.select %23, %25, %14 : vector<2x1xi1>, vector<2x1xi32>
    %27 = vector.extract_strided_slice %9 {offsets = [0, 0], sizes = [1, 32], strides = [1, 1]} : vector<2x32xf32> to vector<1x32xf32>
    %28 = vector.extract_strided_slice %9 {offsets = [0, 0], sizes = [1, 32], strides = [1, 1]} : vector<2x32xf32> to vector<1x32xf32>
    %29 = tpu.concatenate %27, %28 in 0 : vector<1x32xf32>, vector<1x32xf32> -> vector<2x32xf32>
    %c0_i32_13 = arith.constant 0 : i32
    %30 = vector.broadcast %c0_i32_13 : i32 to vector<2x1xi32>
    %31 = arith.cmpi eq, %26, %30 : vector<2x1xi32>
    %32 = vector.shape_cast %31 : vector<2x1xi1> to vector<2x1xi1>
    %33 = vector.broadcast %32 : vector<2x1xi1> to vector<2x32xi1>
    %34 = arith.select %33, %9, %29 : vector<2x32xi1>, vector<2x32xf32>
    %cst_14 = arith.constant 7.500000e-01 : f32
    %35 = vector.broadcast %cst_14 : f32 to vector<2x32xf32>
    %36 = arith.mulf %35, %9 : vector<2x32xf32>
    %cst_15 = arith.constant 2.500000e-01 : f32
    %37 = vector.broadcast %cst_15 : f32 to vector<2x32xf32>
    %38 = arith.mulf %37, %34 : vector<2x32xf32>
    %39 = arith.addf %36, %38 : vector<2x32xf32>
    %40 = arith.subf %0, %39 : vector<2x32xf32>
    %c0_16 = arith.constant 0 : index
    %c0_17 = arith.constant 0 : index
    %41 = vector.load %arg5[%c0_16, %c0_17] : memref<2x64xf32, #tpu.memory_space<vmem>>, vector<2x32xf32>
    tpu.vector_store %arg5[%c0_16, %c0_17], %40 {strides = array<i32>} : memref<2x64xf32, #tpu.memory_space<vmem>>, vector<2x32xf32>,
    %42 = vector.extract_strided_slice %9 {offsets = [1, 0], sizes = [1, 32], strides = [1, 1]} : vector<2x32xf32> to vector<1x32xf32>
    %43 = vector.extract_strided_slice %9 {offsets = [1, 0], sizes = [1, 32], strides = [1, 1]} : vector<2x32xf32> to vector<1x32xf32>
    %44 = tpu.concatenate %42, %43 in 0 : vector<1x32xf32>, vector<1x32xf32> -> vector<2x32xf32>
    %c1_i32_18 = arith.constant 1 : i32
    %45 = vector.broadcast %c1_i32_18 : i32 to vector<2x1xi32>
    %46 = arith.cmpi eq, %26, %45 : vector<2x1xi32>
    %47 = vector.shape_cast %46 : vector<2x1xi1> to vector<2x1xi1>
    %48 = vector.broadcast %47 : vector<2x1xi1> to vector<2x32xi1>
    %49 = arith.select %48, %9, %44 : vector<2x32xi1>, vector<2x32xf32>
    %cst_19 = arith.constant 7.500000e-01 : f32
    %50 = vector.broadcast %cst_19 : f32 to vector<2x32xf32>
    %51 = arith.mulf %50, %9 : vector<2x32xf32>
    %cst_20 = arith.constant 2.500000e-01 : f32
    %52 = vector.broadcast %cst_20 : f32 to vector<2x32xf32>
    %53 = arith.mulf %52, %49 : vector<2x32xf32>
    %54 = arith.addf %51, %53 : vector<2x32xf32>
    %55 = arith.subf %1, %54 : vector<2x32xf32>
    %c0_21 = arith.constant 0 : index
    %c32_22 = arith.constant 32 : index
    %56 = vector.load %arg5[%c0_21, %c32_22] : memref<2x64xf32, #tpu.memory_space<vmem>>, vector<2x32xf32>
    tpu.vector_store %arg5[%c0_21, %c32_22], %55 {strides = array<i32>} : memref<2x64xf32, #tpu.memory_space<vmem>>, vector<2x32xf32>,
    return
  }
  func.func @transform_0(%arg0: i32) -> (i32, i32) {
    %c0_i32 = arith.constant 0 : i32
    %c0_i32_0 = arith.constant 0 : i32
    return %arg0, %c0_i32 : i32, i32
  }
  func.func @transform_1(%arg0: i32) -> (i32, i32) {
    %c0_i32 = arith.constant 0 : i32
    %c0_i32_0 = arith.constant 0 : i32
    %c0_i32_1 = arith.constant 0 : i32
    return %c0_i32, %c0_i32_0 : i32, i32
  }
  func.func @transform_2(%arg0: i32) -> (i32, i32) {
    %c0_i32 = arith.constant 0 : i32
    %c0_i32_0 = arith.constant 0 : i32
    %c0_i32_1 = arith.constant 0 : i32
    return %c0_i32, %c0_i32_0 : i32, i32
  }
  func.func @transform_3(%arg0: i32) -> (i32, i32) {
    %c0_i32 = arith.constant 0 : i32
    %c0_i32_0 = arith.constant 0 : i32
    return %arg0, %c0_i32 : i32, i32
  }
  func.func @transform_4(%arg0: i32) -> (i32, i32) {
    %c0_i32 = arith.constant 0 : i32
    %c0_i32_0 = arith.constant 0 : i32
    return %arg0, %c0_i32 : i32, i32
  }
}

</mosaic_0001>

<bundles_post_ra>
// kernel: laplacian_pyramid.4
= control target key start
LH: loop header
LB: loop body
LE: loop exit
PB: predicated region body
PF: predicated region fallthrough
CT: control target
= control target key end

     0   :  { %v307_v1 = vmov 0.0|0.0   ;;  %vm308_vm0 = vmmov 0   ;;  %v309_v4 = vmov 0.0   ;;  %s310_s21 = smov 64   ;;  %vm31_vm1 = vcmask 523264   ;;  %s392_s0 = inlined_call_operand.vmem [shape: f32[4,128], index: 0, kind: input, shape index: {}]   ;;  %s393_s1 = inlined_call_operand.vmem [shape: f32[64,32], index: 1, kind: input, shape index: {}]   ;;  %s394_s2 = inlined_call_operand.vmem [shape: f32[32,64], index: 2, kind: input, shape index: {}]   ;;  %s395_s3 = inlined_call_operand.vmem [shape: f32[4,32], index: 3, kind: output, shape index: {0}]   ;;  %s396_s4 = inlined_call_operand.vmem [shape: f32[4,128], index: 4, kind: output, shape index: {1}]  }
   0x1   :  { %v339_v0 = vld [vmem:[%s392_s0] sm:$0xf]  ;;  %285 = vmatprep.subr.bf16.mxu0 %v307_v1  ;;  %v24_v3 = vld [vmem:[%s393_s1 + $0x8] sm:$0xff]  ;;  %271 = vmatprep.mubr.msk.f32.mxu0 %vm308_vm0, %v309_v4  ;;  %v25_v6 = vld [vmem:[%s393_s1 + $0x10] sm:$0xff]  ;;  %vm105_vm2 = vcmask 257024   ;;  %vm111_vm3 = vcmask 261120   ;;  %v185_v26 = vlaneseq }
   0x2   :  { %v23_v2 = vld [vmem:[%s393_s1] sm:$0xff]  ;;  %18 = vrot.lane.b32.xlu0 %v339_v0, %s310_s21  ;;  %v26_v7 = vld [vmem:[%s393_s1 + $0x18] sm:$0xff]  ;;  %297 = vmatprep.subr.bf16.mxu1 %v307_v1  ;;  %v108_v10 = vld [vmem:[%s394_s2 + $0x8] sm:$0xff]  ;;  %vm202_vm4 = vcmask 1040384   ;;  %vm216_vm5 = vcmask 1042432   ;;  %vm212_vm8 = vcmask 519168  }
   0x3   :  { %v286_v5 = vpack.c.bf16 %v24_v3, %v23_v2  ;;  %282 = vmatprep.mubr.msk.f32.mxu1 %vm308_vm0, %v309_v4  ;;  %v289_v8 = vpack.c.bf16 %v26_v7, %v25_v6  ;;  %v107_v9 = vld [vmem:[%s394_s2] sm:$0xff]  ;;  %v109_v11 = vld [vmem:[%s394_s2 + $0x10] sm:$0xff]  ;;  %v28_v13 = vld [vmem:[%s393_s1 + $0x28] sm:$0xff]  ;;  %v186_v27 = vshrl.u32 %v185_v26, 7  ;;  %vm229_vm9 = vcmask 1043968  }
   0x4   :  { %v27_v12 = vld [vmem:[%s393_s1 + $0x20] sm:$0xff]  ;;  %v298_v14 = vpack.c.bf16 %v108_v10, %v107_v9  ;;  %v110_v15 = vld [vmem:[%s394_s2 + $0x18] sm:$0xff]  ;;  %v29_v18 = vld [vmem:[%s393_s1 + $0x30] sm:$0xff] }
   0x5   :  { %287 = vmatpush3.bf16.msra.mxu0 %v286_v5  ;;  %v301_v16 = vpack.c.bf16 %v110_v15, %v109_v11  ;;  %v292_v17 = vpack.c.bf16 %v28_v13, %v27_v12  ;;  %v30_v19 = vld [vmem:[%s393_s1 + $0x38] sm:$0xff]  ;;  %v191_v28 = vand.u32 3, %v186_v27 }
   0x6   :  { %288 = vmatprep.subr.bf16.mxu0 %v307_v1  ;;  %299 = vmatpush3.bf16.msra.mxu1 %v298_v14  ;;  %v295_v20 = vpack.c.bf16 %v30_v19, %v29_v18 }
   0x7   :  { %300 = vmatprep.subr.bf16.mxu1 %v307_v1  ;;  %vm204_vm6 = vcmp.eq.s32.totalorder %v191_v28, 0  ;;  %vm218_vm7 = vcmp.eq.s32.totalorder %v191_v28, 3 }
   0x9   :  { %290 = vmatpush3.bf16.msra.mxu0 %v289_v8 }
   0xa   :  { %291 = vmatprep.subr.bf16.mxu0 %v307_v1  ;;  %302 = vmatpush3.bf16.msra.mxu1 %v301_v16 }
   0xd   :  { %293 = vmatpush3.bf16.msra.mxu0 %v292_v17 }
   0xe   :  { %294 = vmatprep.subr.bf16.mxu0 %v307_v1 }
  0x11   :  { %296 = vmatpush3.bf16.msra.mxu0 %v295_v20 }
  0x74   :  { %v19_v21 = vpop.permute.xlu0 %18 }
  0x75   :  { %v21_v22 = vadd.f32 %v19_v21, %v339_v0 }
  0x77   :  { %v22_v23 = vmul.f32 0.5, %v21_v22 }
  0x79   :  { %272 = vmatmul.mubr.msk.f32.vlgmr.msra.gmra.mrb[0].mxu0 %vm31_vm1, %v22_v23 }
 0x14c   :  { %v101_v24 = vpop.f32.mrb[0].mxu0 }
 0x14d   :  { %106 = vst.msk [vmem:[%s395_s3] sm:$0xf] %vm105_vm2, %v101_v24  ;;  %v273_v25 = vpop.f32.mrb[1].mxu0  ;;  %283 = vmatmul.mubr.msk.f32.vlgmr.msra.gmra.mrb[0].mxu1 %vm111_vm3, %v101_v24 }
 0x220   :  { %v181_v29 = vpop.f32.mrb[0].mxu1 }
 0x221   :  { %v200_v30 = vrot.slane %v181_v29, 7  ;;  %v284_v31 = vpop.f32.mrb[1].mxu1  ;;  %v214_v32 = vrot.slane %v181_v29, 1  ;;  %v208_v37 = vmul.f32 0.75, %v181_v29 }
 0x223   :  { %v217_v33 = vsel %vm216_vm5, %v214_v32, %v181_v29  ;;  %v203_v34 = vsel %vm202_vm4, %v181_v29, %v200_v30 }
 0x224   :  { %v221_v35 = vsel %vm218_vm7, %v181_v29, %v217_v33  ;;  %v207_v36 = vsel %vm204_vm6, %v181_v29, %v203_v34 }
 0x225   :  { %v222_v38 = vmul.f32 0.25, %v221_v35  ;;  %v209_v39 = vmul.f32 0.25, %v207_v36 }
 0x227   :  { %v223_v40 = vadd.f32 %v222_v38, %v208_v37  ;;  %v210_v41 = vadd.f32 %v209_v39, %v208_v37 }
 0x229   :  { %225 = vrot.lane.b32.xlu0 %v223_v40, %s310_s21  ;;  %v211_v42 = vsub.f32 %v339_v0, %v210_v41 }
 0x22b   :  { %213 = vst.msk [vmem:[%s396_s4] sm:$0xf] %vm212_vm8, %v211_v42 }
 0x29b   :  { %v226_v43 = vpop.permute.xlu0 %225 }
 0x29c   :  { %v228_v44 = vsub.f32 %v339_v0, %v226_v43 }
 0x29e   :  { %230 = vst.msk [vmem:[%s396_s4] sm:$0xf] %vm229_vm9, %v228_v44 }

// kernel: laplacian_pyramid.3
= control target key start
LH: loop header
LB: loop body
LE: loop exit
PB: predicated region body
PF: predicated region fallthrough
CT: control target
= control target key end

     0   :  { %v350_v0 = vmov 0.0|0.0   ;;  %vm351_vm0 = vmmov 0   ;;  %v352_v4 = vmov 0.0   ;;  %vm106_vm1 = vcmask 523264   ;;  %s477_s1 = inlined_call_operand.vmem [shape: f32[128,64], index: 1, kind: input, shape index: {}]   ;;  %s478_s2 = inlined_call_operand.vmem [shape: f32[64,128], index: 2, kind: input, shape index: {}]   ;;  %s479_s0 = inlined_call_operand.vmem [shape: f32[8,256], index: 0, kind: input, shape index: {}]   ;;  %s480_s3 = inlined_call_operand.vmem [shape: f32[8,64], index: 3, kind: output, shape index: {0}]   ;;  %s481_s4 = inlined_call_operand.vmem [shape: f32[8,256], index: 4, kind: output, shape index: {1}]  }
   0x1   :  { %311 = vmatprep.subr.bf16.mxu0 %v350_v0  ;;  %v20_v1 = vld [vmem:[%s477_s1] sm:$0xff]  ;;  %v21_v2 = vld [vmem:[%s477_s1 + $0x8] sm:$0xff]  ;;  %v22_v3 = vld [vmem:[%s477_s1 + $0x10] sm:$0xff]  ;;  %289 = vmatprep.mubr.msk.f32.mxu0 %vm351_vm0, %v352_v4  ;;  %v189_v44 = vlaneseq }
   0x2   :  { %v312_v5 = vpack.c.bf16 %v21_v2, %v20_v1  ;;  %v23_v6 = vld [vmem:[%s477_s1 + $0x18] sm:$0xff]  ;;  %335 = vmatprep.subr.bf16.mxu1 %v350_v0  ;;  %308 = vmatprep.mubr.msk.f32.mxu1 %vm351_vm0, %v352_v4  ;;  %v24_v8 = vld [vmem:[%s477_s1 + $0x20] sm:$0xff]  ;;  %v25_v9 = vld [vmem:[%s477_s1 + $0x28] sm:$0xff] }
   0x3   :  { %v315_v7 = vpack.c.bf16 %v23_v6, %v22_v3  ;;  %v108_v10 = vld [vmem:[%s478_s2] sm:$0xff]  ;;  %v109_v11 = vld [vmem:[%s478_s2 + $0x8] sm:$0xff]  ;;  %v110_v12 = vld [vmem:[%s478_s2 + $0x10] sm:$0xff]  ;;  %v318_v13 = vpack.c.bf16 %v25_v9, %v24_v8  ;;  %v190_v45 = vshrl.u32 %v189_v44, 7 }
   0x4   :  { %313 = vmatpush3.bf16.msra.mxu0 %v312_v5  ;;  %v336_v14 = vpack.c.bf16 %v109_v11, %v108_v10  ;;  %v111_v15 = vld [vmem:[%s478_s2 + $0x18] sm:$0xff]  ;;  %v26_v16 = vld [vmem:[%s477_s1 + $0x30] sm:$0xff]  ;;  %v112_v19 = vld [vmem:[%s478_s2 + $0x20] sm:$0xff] }
   0x5   :  { %314 = vmatprep.subr.bf16.mxu0 %v350_v0  ;;  %v27_v17 = vld [vmem:[%s477_s1 + $0x38] sm:$0xff]  ;;  %v339_v18 = vpack.c.bf16 %v111_v15, %v110_v12  ;;  %v113_v20 = vld [vmem:[%s478_s2 + $0x28] sm:$0xff]  ;;  %v28_v22 = vld [vmem:[%s477_s1 + $0x40] sm:$0xff]  ;;  %v195_v46 = vand.u32 7, %v190_v45 }
   0x6   :  { %337 = vmatpush3.bf16.msra.mxu1 %v336_v14  ;;  %v321_v21 = vpack.c.bf16 %v27_v17, %v26_v16  ;;  %v29_v23 = vld [vmem:[%s477_s1 + $0x48] sm:$0xff]  ;;  %v342_v24 = vpack.c.bf16 %v113_v20, %v112_v19  ;;  %v114_v25 = vld [vmem:[%s478_s2 + $0x30] sm:$0xff]  ;;  %v115_v26 = vld [vmem:[%s478_s2 + $0x38] sm:$0xff] }
   0x7   :  { %338 = vmatprep.subr.bf16.mxu1 %v350_v0  ;;  %v324_v27 = vpack.c.bf16 %v29_v23, %v28_v22  ;;  %v30_v28 = vld [vmem:[%s477_s1 + $0x50] sm:$0xff]  ;;  %v31_v29 = vld [vmem:[%s477_s1 + $0x58] sm:$0xff]  ;;  %v345_v30 = vpack.c.bf16 %v115_v26, %v114_v25  ;;  %v32_v32 = vld [vmem:[%s477_s1 + $0x60] sm:$0xff]  ;;  %vm204_vm2 = vcmp.eq.s32.totalorder %v195_v46, 0  ;;  %vm214_vm3 = vcmp.eq.s32.totalorder %v195_v46, 7 }
   0x8   :  { %316 = vmatpush3.bf16.msra.mxu0 %v315_v7  ;;  %v327_v31 = vpack.c.bf16 %v31_v29, %v30_v28  ;;  %v33_v33 = vld [vmem:[%s477_s1 + $0x68] sm:$0xff]  ;;  %v16_v35 = vld [vmem:[%s479_s0] sm:$0xff]  ;;  %v34_v37 = vld [vmem:[%s477_s1 + $0x70] sm:$0xff] }
   0x9   :  { %317 = vmatprep.subr.bf16.mxu0 %v350_v0  ;;  %v330_v34 = vpack.c.bf16 %v33_v33, %v32_v32  ;;  %v17_v36 = vld [vmem:[%s479_s0 + $0x8] sm:$0xff]  ;;  %v35_v38 = vld [vmem:[%s477_s1 + $0x78] sm:$0xff] }
   0xa   :  { %340 = vmatpush3.bf16.msra.mxu1 %v339_v18  ;;  %v18_v39 = vadd.f32 %v17_v36, %v16_v35  ;;  %v333_v40 = vpack.c.bf16 %v35_v38, %v34_v37 }
   0xb   :  { %341 = vmatprep.subr.bf16.mxu1 %v350_v0 }
   0xc   :  { %319 = vmatpush3.bf16.msra.mxu0 %v318_v13  ;;  %v19_v41 = vmul.f32 0.5, %v18_v39 }
   0xd   :  { %320 = vmatprep.subr.bf16.mxu0 %v350_v0 }
   0xe   :  { %343 = vmatpush3.bf16.msra.mxu1 %v342_v24 }
   0xf   :  { %344 = vmatprep.subr.bf16.mxu1 %v350_v0 }
  0x10   :  { %322 = vmatpush3.bf16.msra.mxu0 %v321_v21 }
  0x11   :  { %323 = vmatprep.subr.bf16.mxu0 %v350_v0 }
  0x12   :  { %346 = vmatpush3.bf16.msra.mxu1 %v345_v30 }
  0x14   :  { %325 = vmatpush3.bf16.msra.mxu0 %v324_v27 }
  0x15   :  { %326 = vmatprep.subr.bf16.mxu0 %v350_v0 }
  0x18   :  { %328 = vmatpush3.bf16.msra.mxu0 %v327_v31 }
  0x19   :  { %329 = vmatprep.subr.bf16.mxu0 %v350_v0 }
  0x1c   :  { %331 = vmatpush3.bf16.msra.mxu0 %v330_v34 }
  0x1d   :  { %332 = vmatprep.subr.bf16.mxu0 %v350_v0 }
  0x20   :  { %334 = vmatpush3.bf16.msra.mxu0 %v333_v40 }
  0x23   :  { %290 = vmatmul.mubr.f32.vlgmr.msra.gmra.mrb[0].mxu0 %v19_v41 }
  0xf6   :  { %v102_v42 = vpop.f32.mrb[0].mxu0 }
  0xf7   :  { %107 = vst.msk [vmem:[%s480_s3] sm:$0xff] %vm106_vm1, %v102_v42  ;;  %v291_v43 = vpop.f32.mrb[1].mxu0  ;;  %309 = vmatmul.mubr.msk.f32.vlgmr.msra.gmra.mrb[0].mxu1 %vm106_vm1, %v102_v42 }
 0x1ca   :  { %v185_v47 = vpop.f32.mrb[0].mxu1 }
 0x1cb   :  { %v203_v48 = vrot.slane %v185_v47, 7  ;;  %v213_v49 = vrot.slane %v185_v47, 1  ;;  %v310_v50 = vpop.f32.mrb[1].mxu1  ;;  %v208_v53 = vmul.f32 0.75, %v185_v47 }
 0x1cd   :  { %v207_v51 = vsel %vm204_vm2, %v185_v47, %v203_v48  ;;  %v217_v52 = vsel %vm214_vm3, %v185_v47, %v213_v49 }
 0x1ce   :  { %v209_v54 = vmul.f32 0.25, %v207_v51  ;;  %v218_v55 = vmul.f32 0.25, %v217_v52 }
 0x1d0   :  { %v210_v56 = vadd.f32 %v209_v54, %v208_v53  ;;  %v219_v57 = vadd.f32 %v218_v55, %v208_v53 }
 0x1d2   :  { %v211_v58 = vsub.f32 %v16_v35, %v210_v56  ;;  %v220_v59 = vsub.f32 %v17_v36, %v219_v57 }
 0x1d4   :  { %212 = vst [vmem:[%s481_s4] sm:$0xff] %v211_v58  ;;  %221 = vst [vmem:[%s481_s4 + $0x8] sm:$0xff] %v220_v59 }

// kernel: laplacian_pyramid.5
= control target key start
LH: loop header
LB: loop body
LE: loop exit
PB: predicated region body
PF: predicated region fallthrough
CT: control target
= control target key end

     0   :  { %v274_v1 = vmov 0.0|0.0   ;;  %vm275_vm0 = vmmov 0   ;;  %v276_v4 = vmov 0.0   ;;  %s277_s21 = smov 96   ;;  %vm27_vm1 = vcmask 261120   ;;  %s340_s0 = inlined_call_operand.vmem [shape: f32[2,64], index: 0, kind: input, shape index: {}]   ;;  %s341_s1 = inlined_call_operand.vmem [shape: f32[32,16], index: 1, kind: input, shape index: {}]   ;;  %s342_s2 = inlined_call_operand.vmem [shape: f32[16,32], index: 2, kind: input, shape index: {}]   ;;  %s343_s3 = inlined_call_operand.vmem [shape: f32[2,16], index: 3, kind: output, shape index: {0}]   ;;  %s344_s4 = inlined_call_operand.vmem [shape: f32[2,64], index: 4, kind: output, shape index: {1}]  }
   0x1   :  { %v307_v0 = vld [vmem:[%s340_s0] sm:$0x3]  ;;  %260 = vmatprep.subr.bf16.mxu0 %v274_v1  ;;  %v24_v3 = vld [vmem:[%s341_s1 + $0x8] sm:$0xff]  ;;  %250 = vmatprep.mubr.msk.f32.mxu0 %vm275_vm0, %v276_v4  ;;  %v25_v6 = vld [vmem:[%s341_s1 + $0x10] sm:$0xff]  ;;  %vm101_vm2 = vcmask 123904   ;;  %vm105_vm3 = vcmask 130048   ;;  %v179_v17 = vlaneseq }
   0x2   :  { %v23_v2 = vld [vmem:[%s341_s1] sm:$0xff]  ;;  %18 = vrot.lane.b32.xlu0 %v307_v0, %s277_s21  ;;  %v26_v7 = vld [vmem:[%s341_s1 + $0x18] sm:$0xff]  ;;  %266 = vmatprep.subr.bf16.mxu1 %v274_v1  ;;  %v104_v9 = vld [vmem:[%s342_s2 + $0x8] sm:$0xff]  ;;  %vm196_vm4 = vcmask 1040384   ;;  %vm206_vm7 = vcmask 254976   ;;  %vm222_vm8 = vcmask 517376  }
   0x3   :  { %v261_v5 = vpack.c.bf16 %v24_v3, %v23_v2  ;;  %v103_v8 = vld [vmem:[%s342_s2] sm:$0xff]  ;;  %257 = vmatprep.mubr.msk.f32.mxu1 %vm275_vm0, %v276_v4  ;;  %v264_v10 = vpack.c.bf16 %v26_v7, %v25_v6  ;;  %v180_v18 = vshrl.u32 %v179_v17, 7  ;;  %s278_s2 = smov 32  }
   0x4   :  { %v267_v11 = vpack.c.bf16 %v104_v9, %v103_v8 }
   0x5   :  { %262 = vmatpush3.bf16.msra.mxu0 %v261_v5  ;;  %v185_v19 = vand.u32 1, %v180_v18 }
   0x6   :  { %263 = vmatprep.subr.bf16.mxu0 %v274_v1  ;;  %268 = vmatpush3.bf16.msra.mxu1 %v267_v11 }
   0x7   :  { %vm198_vm5 = vcmp.eq.s32.totalorder %v185_v19, 0  ;;  %vm211_vm6 = vcmp.eq.s32.totalorder %v185_v19, 1 }
   0x9   :  { %265 = vmatpush3.bf16.msra.mxu0 %v264_v10 }
  0x74   :  { %v19_v12 = vpop.permute.xlu0 %18 }
  0x75   :  { %v21_v13 = vadd.f32 %v19_v12, %v307_v0 }
  0x77   :  { %v22_v14 = vmul.f32 0.5, %v21_v13 }
  0x79   :  { %251 = vmatmul.mubr.msk.f32.vlgmr.msra.gmra.mrb[0].mxu0 %vm27_vm1, %v22_v14 }
 0x14c   :  { %v97_v15 = vpop.f32.mrb[0].mxu0 }
 0x14d   :  { %102 = vst.msk [vmem:[%s343_s3] sm:$0x3] %vm101_vm2, %v97_v15  ;;  %v252_v16 = vpop.f32.mrb[1].mxu0  ;;  %258 = vmatmul.mubr.msk.f32.vlgmr.msra.gmra.mrb[0].mxu1 %vm105_vm3, %v97_v15 }
 0x220   :  { %v175_v20 = vpop.f32.mrb[0].mxu1 }
 0x221   :  { %v194_v21 = vrot.slane %v175_v20, 7  ;;  %v259_v22 = vpop.f32.mrb[1].mxu1  ;;  %v208_v23 = vrot.slane %v175_v20, 1  ;;  %v202_v28 = vmul.f32 0.75, %v175_v20 }
 0x223   :  { %v210_v24 = vsel %vm196_vm4, %v208_v23, %v175_v20  ;;  %v197_v25 = vsel %vm196_vm4, %v175_v20, %v194_v21 }
 0x224   :  { %v214_v26 = vsel %vm211_vm6, %v175_v20, %v210_v24  ;;  %v201_v27 = vsel %vm198_vm5, %v175_v20, %v197_v25 }
 0x225   :  { %v215_v29 = vmul.f32 0.25, %v214_v26  ;;  %v203_v30 = vmul.f32 0.25, %v201_v27 }
 0x227   :  { %v216_v31 = vadd.f32 %v215_v29, %v202_v28  ;;  %v204_v32 = vadd.f32 %v203_v30, %v202_v28 }
 0x229   :  { %218 = vrot.lane.b32.xlu0 %v216_v31, %s278_s2  ;;  %v205_v33 = vsub.f32 %v307_v0, %v204_v32 }
 0x22b   :  { %207 = vst.msk [vmem:[%s344_s4] sm:$0x3] %vm206_vm7, %v205_v33 }
 0x29b   :  { %v219_v34 = vpop.permute.xlu0 %218 }
 0x29c   :  { %v221_v35 = vsub.f32 %v307_v0, %v219_v34 }
 0x29e   :  { %223 = vst.msk [vmem:[%s344_s4] sm:$0x3] %vm222_vm8, %v221_v35 }

</bundles_post_ra>
